<compile_context>
chip_gen: v7x
topology: tpu7x:2x2x1
jax: 0.10.0
libtpu: 0.0.40
codegen_flags: <defaults>
</compile_context>

<pallas_src>
import jax
import jax.numpy as jnp
from jax.experimental import pallas as pl
from jax.experimental.pallas import tpu as pltpu


def _round_up(x, m):
    return ((x + m - 1) // m) * m


def _vmem_capacity_bytes():
    """Physical per-core VMEM; conservative 64 MiB fallback (v7x) if unknown."""
    try:
        return int(pltpu.get_tpu_info().vmem_capacity_bytes)
    except Exception:
        return 64 * 1024 * 1024


# --------------------------------------------------------------------------
# Kernels
# --------------------------------------------------------------------------
def _frame_logistic_single_kernel(x_ref, nf_ref, w_ref, b_ref, o_ref):
    # x_ref : (tb, T, F)  whole frame slab for this batch tile
    # nf_ref: (tb, 1)     frame counts
    # w_ref : (F, Vp)     resident weight, MXU-native orientation
    # b_ref : (1, Vp)     resident bias
    # o_ref : (tb, Vp)
    pooled = jnp.sum(x_ref[...].astype(jnp.float32), axis=1)        # (tb, F)
    pooled = pooled * pl.reciprocal(nf_ref[...], approx=False)      # (tb, F)
    out = jnp.dot(pooled, w_ref[...], preferred_element_type=jnp.float32)
    o_ref[...] = (out + b_ref[...]).astype(o_ref.dtype)


def _frame_logistic_streamed_kernel(x_ref, nf_ref, w_ref, b_ref, o_ref, acc_ref):
    # x_ref  : (tb, tt, F) streamed frame tile (T axis is the reduction)
    # acc_ref: (tb, F)     f32 VMEM accumulator, resident across the T axis
    t = pl.program_id(1)
    partial = jnp.sum(x_ref[...].astype(jnp.float32), axis=1)       # (tb, F)

    @pl.when(t == 0)
    def _init():
        acc_ref[...] = partial                                       # write, not add

    @pl.when(t > 0)
    def _accumulate():
        acc_ref[...] += partial

    @pl.when(t == pl.num_programs(1) - 1)
    def _finalize():
        pooled = acc_ref[...] * pl.reciprocal(nf_ref[...], approx=False)
        out = jnp.dot(pooled, w_ref[...], preferred_element_type=jnp.float32)
        o_ref[...] = (out + b_ref[...]).astype(o_ref.dtype)


# --------------------------------------------------------------------------
# Wrapper
# --------------------------------------------------------------------------
def frame_level_logistic(model_input, num_frames, weight, bias, *, tb=None, tt=None):
    """model_input: (B, T, F); num_frames: (B, 1); weight: (V, F) PyTorch Linear
    layout; bias: (V,)  ->  (B, V) float32."""
    B, T, F = model_input.shape
    V = weight.shape[0]
    itemsize = jnp.dtype(model_input.dtype).itemsize

    Vp = _round_up(V, 128)            # lane-dense output / full MXU columns
    Fp = _round_up(F, 128)            # lane-padded width actually held in VMEM

    # ---- batch tile ------------------------------------------------------
    Bp8 = _round_up(B, 8)
    if tb is None:
        if Bp8 <= 8:
            tb = Bp8                                   # tiny B: no batch padding
        elif Bp8 <= 256:
            tb = _round_up(pl.cdiv(Bp8, 2), 8)         # >=2 parallel steps (v7x megacore)
        else:
            tb = 128                                   # many steps, MXU-friendly rows
    Bp = _round_up(B, tb)

    # ---- VMEM budget & frame tile ----------------------------------------
    capacity = _vmem_capacity_bytes()
    cap = int(0.75 * capacity)        # ~48 MiB on v7x, ~96 MiB on v5e/v6e
    headroom = 2 << 20
    sublane = 16 if itemsize == 2 else 8               # bf16 packs 16 rows / vreg

    # Exact footprint of everything except the streamed x tiles (residents are
    # counted at 2 buffers each, matching the default pipeliner).
    fixed = (2 * Fp * Vp * 4          # resident weight
             + 2 * 8 * Vp * 4         # resident bias
             + 2 * tb * 128 * 4       # resident num_frames
             + 2 * tb * Vp * 4        # output tile
             + tb * Fp * 4)           # f32 accumulator scratch

    row_bytes = tb * Fp * itemsize    # one frame-row group across the batch tile
    x_budget = max(cap - fixed - headroom, 2 * sublane * row_bytes)
    per_buf_target = max(min(x_budget // 2, 16 << 20), sublane * row_bytes)

    if tt is None:
        tt = max(sublane, (per_buf_target // row_bytes) // sublane * sublane)
    tt = max(sublane, (tt // sublane) * sublane)

    single_pass = tt >= T
    if single_pass:
        T_block, Tp = T, T            # whole slab per step; no T padding needed
    else:
        # Rebalance tt so the last T step carries minimal zero padding.
        n_t = pl.cdiv(T, tt)
        tt = _round_up(pl.cdiv(T, n_t), sublane)
        Tp = tt * n_t
        T_block = tt

    # ---- operand padding ---------------------------------------------------
    x = model_input
    pad_t = 0 if single_pass else Tp - T
    if Bp != B or pad_t:
        # Zero-padded frames add nothing to the sum => semantics preserved.
        x = jnp.pad(x, ((0, Bp - B), (0, pad_t), (0, 0)))
    nf = jnp.asarray(num_frames, jnp.float32).reshape(-1, 1)
    if Bp != B:
        nf = jnp.pad(nf, ((0, Bp - B), (0, 0)), constant_values=1.0)  # avoid inf in dead rows
    wT = weight.T                      # (F, V): MXU-native orientation, done once
    b2 = bias.reshape(1, V)
    if Vp != V:
        wT = jnp.pad(wT, ((0, 0), (0, Vp - V)))
        b2 = jnp.pad(b2, ((0, 0), (0, Vp - V)))

    # ---- exact VMEM request -------------------------------------------------
    tt_pad = _round_up(T_block, sublane)
    need = fixed + 2 * tb * tt_pad * Fp * itemsize
    vmem_limit = int(max(min(need + headroom, cap), 4 << 20))
    if need + headroom > vmem_limit:              # pathological: residents exceed cap
        vmem_limit = int(min(need + headroom, capacity))

    # ---- pallas_call ---------------------------------------------------------
    if single_pass:
        grid = (Bp // tb,)
        kernel = _frame_logistic_single_kernel
        in_specs = [
            pl.BlockSpec((tb, T_block, F), lambda b: (b, 0, 0)),   # x slab
            pl.BlockSpec((tb, 1), lambda b: (b, 0)),               # num_frames
            pl.BlockSpec((F, Vp), lambda b: (0, 0)),               # weight (resident)
            pl.BlockSpec((1, Vp), lambda b: (0, 0)),               # bias (resident)
        ]
        out_specs = pl.BlockSpec((tb, Vp), lambda b: (b, 0))
        scratch_shapes = []
        dims = ("parallel",)
    else:
        grid = (Bp // tb, Tp // tt)
        kernel = _frame_logistic_streamed_kernel
        in_specs = [
            pl.BlockSpec((tb, tt, F), lambda b, t: (b, t, 0)),     # x tile (streamed)
            pl.BlockSpec((tb, 1), lambda b, t: (b, 0)),            # num_frames
            pl.BlockSpec((F, Vp), lambda b, t: (0, 0)),            # weight (resident)
            pl.BlockSpec((1, Vp), lambda b, t: (0, 0)),            # bias (resident)
        ]
        out_specs = pl.BlockSpec((tb, Vp), lambda b, t: (b, 0))
        scratch_shapes = [pltpu.VMEM((tb, F), jnp.float32)]
        dims = ("parallel", "arbitrary")

    out = pl.pallas_call(
        kernel,
        out_shape=jax.ShapeDtypeStruct((Bp, Vp), jnp.float32),
        grid_spec=pltpu.PrefetchScalarGridSpec(
            num_scalar_prefetch=0,
            grid=grid,
            in_specs=in_specs,
            out_specs=out_specs,
            scratch_shapes=scratch_shapes,
        ),
        compiler_params=pltpu.CompilerParams(
            dimension_semantics=dims,
            vmem_limit_bytes=vmem_limit,
        ),
    )(x, nf, wT, b2)
    return out[:B, :V]


if __name__ == "__main__":
    # Small shapes consistent with the module (T frames, F feature size, V vocab).
    B, T, F, V = 12, 16, 128, 16

    key = jax.random.PRNGKey(0)
    kx, kn, kw, kb = jax.random.split(key, 4)

    model_input = jax.random.normal(kx, (B, T, F), dtype=jnp.float32)
    num_frames = jax.random.randint(kn, (B, 1), 1, T + 1).astype(jnp.float32)
    # Synthetic nn.Linear parameters: weight (V, F), bias (V,).
    weight = jax.random.normal(kw, (V, F), dtype=jnp.float32) * 0.05
    bias = jax.random.normal(kb, (V,), dtype=jnp.float32) * 0.05

    # Pure-JAX reference.
    ref = (jnp.sum(model_input, axis=1) / num_frames.reshape(-1, 1)) @ weight.T + bias

    # 1) Default path: single-pass kernel (whole T slab fits the x buffer).
    out1 = jax.block_until_ready(
        frame_level_logistic(model_input, num_frames, weight, bias))
    assert out1.shape == (B, V)
    assert jnp.allclose(out1, ref, atol=2e-4, rtol=2e-4), float(
        jnp.max(jnp.abs(out1 - ref)))

    # 2) Forced small tt: exercises the streamed (accumulator) path too.
    out2 = jax.block_until_ready(
        frame_level_logistic(model_input, num_frames, weight, bias, tt=8))
    assert jnp.allclose(out2, ref, atol=2e-4, rtol=2e-4), float(
        jnp.max(jnp.abs(out2 - ref)))

    print("KERNEL_OK")
</pallas_src>

<mosaic_0001>
module attributes {stable_mosaic.version = 11 : i64} {
  func.func @_frame_logistic_single_kernel(%arg0: i32, %arg1: memref<8x16x128xf32, #tpu.memory_space<vmem>>, %arg2: memref<8x1xf32, #tpu.memory_space<vmem>>, %arg3: memref<128x128xf32, #tpu.memory_space<vmem>>, %arg4: memref<1x128xf32, #tpu.memory_space<vmem>>, %arg5: memref<8x128xf32, #tpu.memory_space<vmem>>) attributes {dimension_semantics = [#tpu.dimension_semantics<parallel>], iteration_bounds = array<i64: 2>, scalar_prefetch = 0 : i64, scratch_operands = 0 : i64, tpu.core_type = #tpu.core_type<tc>, window_params = [{transform_indices = @transform_0, window_bounds = array<i64: 8, 16, 128>}, {transform_indices = @transform_1, window_bounds = array<i64: 8, 1>}, {pipeline_mode = #tpu.pipeline_mode<synchronous>, transform_indices = @transform_2, window_bounds = array<i64: 128, 128>}, {pipeline_mode = #tpu.pipeline_mode<synchronous>, transform_indices = @transform_3, window_bounds = array<i64: 1, 128>}, {transform_indices = @transform_4, window_bounds = array<i64: 8, 128>}]} {
    %c0 = arith.constant 0 : index
    %c0_0 = arith.constant 0 : index
    %c0_1 = arith.constant 0 : index
    %0 = vector.load %arg1[%c0, %c0_0, %c0_1] : memref<8x16x128xf32, #tpu.memory_space<vmem>>, vector<8x16x128xf32>
    %cst = arith.constant dense<0.000000e+00> : vector<8x128xf32>
    %1 = vector.multi_reduction <add>, %0, %cst [1] : vector<8x16x128xf32> to vector<8x128xf32>
    %c0_2 = arith.constant 0 : index
    %c0_3 = arith.constant 0 : index
    %2 = vector.load %arg2[%c0_2, %c0_3] : memref<8x1xf32, #tpu.memory_space<vmem>>, vector<8x1xf32>
    %3 = tpu.reciprocal %2 : vector<8x1xf32> -> vector<8x1xf32>
    %4 = vector.broadcast %3 : vector<8x1xf32> to vector<8x128xf32>
    %5 = arith.mulf %1, %4 : vector<8x128xf32>
    %c0_4 = arith.constant 0 : index
    %c0_5 = arith.constant 0 : index
    %6 = vector.load %arg3[%c0_4, %c0_5] : memref<128x128xf32, #tpu.memory_space<vmem>>, vector<128x128xf32>
    %cst_6 = arith.constant dense<0.000000e+00> : vector<8x128xf32>
    %7 = tpu.matmul %5, %6, %cst_6 {dimension_numbers = #tpu.dot_dimension_numbers<[1], [0], [0], [1], [0, 0, 1, 1], [], []>} : vector<8x128xf32>, vector<128x128xf32>, vector<8x128xf32> -> vector<8x128xf32>
    %c0_7 = arith.constant 0 : index
    %c0_8 = arith.constant 0 : index
    %8 = vector.load %arg4[%c0_7, %c0_8] : memref<1x128xf32, #tpu.memory_space<vmem>>, vector<1x128xf32>
    %9 = vector.broadcast %8 : vector<1x128xf32> to vector<8x128xf32>
    %10 = arith.addf %7, %9 : vector<8x128xf32>
    %c0_9 = arith.constant 0 : index
    %c0_10 = arith.constant 0 : index
    %11 = vector.load %arg5[%c0_9, %c0_10] : memref<8x128xf32, #tpu.memory_space<vmem>>, vector<8x128xf32>
    tpu.vector_store %arg5[%c0_9, %c0_10], %10 {strides = array<i32>} : memref<8x128xf32, #tpu.memory_space<vmem>>, vector<8x128xf32>,
    return
  }
  func.func @transform_0(%arg0: i32) -> (i32, i32, i32) {
    %c0_i32 = arith.constant 0 : i32
    %c0_i32_0 = arith.constant 0 : i32
    %c0_i32_1 = arith.constant 0 : i32
    return %arg0, %c0_i32, %c0_i32_0 : i32, i32, i32
  }
  func.func @transform_1(%arg0: i32) -> (i32, i32) {
    %c0_i32 = arith.constant 0 : i32
    %c0_i32_0 = arith.constant 0 : i32
    return %arg0, %c0_i32 : i32, i32
  }
  func.func @transform_2(%arg0: i32) -> (i32, i32) {
    %c0_i32 = arith.constant 0 : i32
    %c0_i32_0 = arith.constant 0 : i32
    %c0_i32_1 = arith.constant 0 : i32
    return %c0_i32, %c0_i32_0 : i32, i32
  }
  func.func @transform_3(%arg0: i32) -> (i32, i32) {
    %c0_i32 = arith.constant 0 : i32
    %c0_i32_0 = arith.constant 0 : i32
    %c0_i32_1 = arith.constant 0 : i32
    return %c0_i32, %c0_i32_0 : i32, i32
  }
  func.func @transform_4(%arg0: i32) -> (i32, i32) {
    %c0_i32 = arith.constant 0 : i32
    %c0_i32_0 = arith.constant 0 : i32
    return %arg0, %c0_i32 : i32, i32
  }
}

</mosaic_0001>

<bundles_post_ra>
// kernel: tpu_custom_call.1
= control target key start
LH: loop header
LB: loop body
LE: loop exit
PB: predicated region body
PF: predicated region fallthrough
CT: control target
= control target key end

     0   :  { %9 = vsyncpa [#allocation3], 0  ;;  %s1139_s0 = inlined_call_operand.hbm [shape: f32[16,16,128], index: 0, kind: input, shape index: {}]   ;;  %s1140_s1 = inlined_call_operand.vmem [shape: f32[16,1], index: 1, kind: input, shape index: {}]   ;;  %s1141_s2 = inlined_call_operand.hbm [shape: f32[128,128], index: 2, kind: input, shape index: {}]   ;;  %s1142_s3 = inlined_call_operand.vmem [shape: f32[1,128], index: 3, kind: input, shape index: {}]   ;;  %s1143_s4 = inlined_call_operand.hbm [shape: f32[16,128], index: 4, kind: output, shape index: {}]  }
   0x1   :  { %11 = vsyncpa [#allocation3 + $0x1], 0 }
   0x2   :  { %12 = vsyncpa [#allocation6], 0 }
   0x3   :  { %13 = vsyncpa [#allocation4], 0 }
   0x4   :  { %15 = vsyncpa [#allocation4 + $0x1], 0  ;;  %s907_s15 = smov 0   ;;  %s909_s16 = smov 0  }
   0x5   :  { %s911_s17 = smov 0   ;;  %s913_s18 = smov 0  }
   0x6 LB: > { %s928_s19 = sadd.s32 4294967295, %s871_s18   ;;  %s581_s20 = sadd.s32 4294967294, %s871_s18   ;;  %s871_s18 = sphi %s913_s18, %s1163_s18   ;;  %s867_s17 = sphi %s911_s17, %s1162_s17   ;;  %s863_s16 = sphi %s909_s16, %s1161_s16   ;;  %s859_s15 = sphi %s907_s15, %s1160_s15  }
   0x7   : > { %p41_p0 = scmp.ne.s32.totalorder %s863_s16, %s859_s15  ;;  %p1144_p1 = scmp.eq.s32.totalorder %s928_s19, 0 }
   0x8   : > { %p139_p3 = scmp.eq.s32.totalorder %s581_s20, 1  ;;  %p582_p5 = scmp.ge.s32.totalorder %s871_s18, 1 }
   0x9   : > { %p937_p4 = por %p1144_p1, %p41_p0  ;;  %p146_p7 = scmp.lt.s32.totalorder %s871_s18, 3 }
   0xa   : > { %p942_p6 = por %p139_p3, %p41_p0  ;;  %s873_s24 = smov [#allocation5]  }
   0xb   : > { %s1147_s21 = scalar_select %p937_p4, 1, 0 }
   0xc   : > { %s1148_s22 = scalar_select %p942_p6, 1, 0 }
   0xd   : > { %p947_p8 = pnand %p582_p5, %p146_p7  ;;  %s158_s25 = sshll.u32 %s873_s24, 4  ;;  %s951_s25 = int_to_ptr.vmem [resolvable:$true] %s158_s25 }
   0xe   : > { %s963_s27 = sadd.s32 1, %s871_s18   ;;  %s28_s28 = sadd.s32 1, %s867_s17 }
   0xf   : > { %s1149_s23 = scalar_select %p947_p8, 1, 0 }
  0x10   : > { %p685_p9 = pneg %p947_p8  ;;  %s25_s29 = ssub.s32 %s871_s18, %s963_s27 }
  0x11   : > { %s743_s6 = scalar_lea.hbm %s1141_s2, 2048 }
  0x12   : > { %p958_p11 = pnand %p685_p9, %p1144_p1  ;;  %p744_p12 = scmp.ne.s32.totalorder %s1141_s2, %s743_s6 }
  0x13   : > { %p750_p5 = scmp.lt.u32.totalorder %s743_s6, %s1141_s2 }
  0x14   : > { %p745_p13 = pneg %p958_p11 }
  0x16   : > { %p746_p0 = pnand %p745_p13, %p744_p12 }
  0x18   : > { %p747_p3 = pneg %p746_p0 }
  0x1a   : > { %p752_p7 = pnand %p750_p5, %p747_p3 }
  0x1c   : > { %755 = shalt.err (!%p752_p7)
}
  0x1d   : > { %s756_s11 = scalar_lea.vmem %s951_s25, 2048  ;;  %p764_p2 = scmp.lt.s32.totalorder %s951_s25, %s951_s25 }
  0x1e   : > { %p757_p9 = scmp.ne.s32.totalorder %s951_s25, %s756_s11  ;;  %p765_p6 = scmp.lt.s32.totalorder %s756_s11, %s756_s11 }
  0x20   : > { %p759_p10 = pnand %p757_p9, %p745_p13  ;;  %p766_p4 = por %p765_p6, %p764_p2 }
  0x22   : > { %p760_p1 = pneg %p759_p10 }
  0x24   : > { %p767_p8 = pnand %p766_p4, %p760_p1 }
  0x26   : > { %770 = shalt.err (!%p767_p8)
}
  0x27   : > { %s874_s12 = smov 128   ;;  %s875_s13 = smov 8  }
  0x28   : > { %688 = dma.hbm_to_vmem [thread:$0]  (!%p958_p11), %s1141_s2, 2048, %s951_s25, [#allocation6], %s874_s12, %s874_s12, %s875_s13  }
  0x29   : > { %p26_p1 = scmp.eq.s32.totalorder %s25_s29, 0  ;;  %p35_p2 = scmp.ne.s32.totalorder %s867_s17, %s863_s16 }
  0x2a   : > { %p36_p4 = scmp.eq.s32.totalorder %s871_s18, 0  ;;  %p698_p6 = scmp.lt.s32.totalorder %s871_s18, 2 }
  0x2b   : > { %s997_s24 = scalar_select %p26_p1, %s867_s17, %s28_s28  }
  0x2c   : > { %p37_p8 = por %p36_p4, %p35_p2  ;;  %p1151_p10 = scmp.eq.s32.totalorder %s928_s19, 1 }
  0x2d   : > { %s175_s26 = sand.u32 1, %s867_s17   ;;  %s600_s5 = sshll.u32 %s871_s18, 11 }
  0x2e   : > { %p1001_p12 = por %p1151_p10, %p35_p2  ;;  %s585_s6 = sshll.u32 %s175_s26, 7 }
  0x2f   : > { %s1010_s9 = scalar_lea.hbm %s1139_s0, %s600_s5  ;;  %s179_s25 = scalar_lea.vmem [#allocation2], %s585_s6 }
  0x30   : > { %s187_s28 = sshll.u32 %s179_s25, 4  ;;  %p1012_p11 = pnand %p698_p6, %p37_p8  ;;  %s1016_s28 = int_to_ptr.vmem [resolvable:$true] %s187_s28 }
  0x31   : > { %s1018_s10 = scalar_lea.sflag [#allocation3], %s175_s26  ;;  %s771_s11 = scalar_lea.hbm %s1010_s9, 2048 }
  0x32   : > { %p772_p13 = scmp.ne.s32.totalorder %s1010_s9, %s771_s11  ;;  %p773_p0 = pneg %p1012_p11 }
  0x33   : > { %s776_s5 = scalar_lea.hbm %s1139_s0, 4096  ;;  %p777_p7 = scmp.lt.u32.totalorder %s1010_s9, %s1139_s0 }
  0x34   : > { %p774_p3 = pnand %p773_p0, %p772_p13  ;;  %p778_p9 = scmp.lt.u32.totalorder %s776_s5, %s771_s11 }
  0x35   : > { %p780_p2 = scmp.lt.u32.totalorder %s771_s11, %s1010_s9 }
  0x36   : > { %p775_p5 = pneg %p774_p3  ;;  %p779_p1 = por %p778_p9, %p777_p7 }
  0x38   : > { %p781_p4 = por %p780_p2, %p779_p1 }
  0x3a   : > { %p782_p6 = pnand %p781_p4, %p775_p5 }
  0x3c   : > { %785 = shalt.err (!%p782_p6)
}
  0x3d   : > { %s786_s26 = scalar_lea.vmem %s1016_s28, 2048  ;;  %s876_s8 = smov [#allocation2]  }
  0x3e   : > { %p787_p8 = scmp.ne.s32.totalorder %s1016_s28, %s786_s26  ;;  %s791_s25 = sshll.u32 %s876_s8, 4  ;;  %s792_s25 = int_to_ptr.vmem [resolvable:$false] %s791_s25 }
  0x3f   : > { %s793_s14 = scalar_lea.vmem %s792_s25, 4096  ;;  %p794_p3 = scmp.lt.s32.totalorder %s1016_s28, %s792_s25 }
  0x40   : > { %p789_p10 = pnand %p787_p8, %p773_p0  ;;  %p795_p7 = scmp.lt.s32.totalorder %s793_s14, %s786_s26 }
  0x42   : > { %p790_p13 = pneg %p789_p10  ;;  %p796_p9 = por %p795_p7, %p794_p3 }
  0x44   : > { %p797_p1 = pnand %p796_p9, %p790_p13 }
  0x46   : > { %800 = shalt.err (!%p797_p1)
}
  0x47   : > { %692 = dma.hbm_to_vmem [thread:$0]  (!%p1012_p11), %s1010_s9, 2048, %s1016_s28, %s1018_s10, %s874_s12, %s874_s12, %s875_s13  }
  0x48   : > { %p1154_p0 = scmp.ne.s32.totalorder %s1149_s23, 0 }
  0x49   : > { %s1052_s11 = sand.u32 (!%p1154_p0), 1, %s863_s16   ;;  %p1155_p5 = scmp.ne.s32.totalorder (!%p1154_p0), %s1147_s21, 0 }
  0x4a   : > { %206 = sbr.rel (%p1154_p0) target bundleno = 472 (0x1d8), region = 36  ;;  %s590_s20 = sshll.u32 (!%p1154_p0), %s1052_s11, 7 }
  0x4b   : > { %s209_s5 = scalar_lea.sflag (!%p1154_p0), [#allocation3], %s1052_s11  ;;  %s1056_s6 = scalar_lea.vmem (!%p1154_p0), [#allocation2], %s590_s20 }
  0x51   : > { %846 = dma.done.wait (%p1155_p5), %s209_s5, 2048  }
  0x52   : > { %848 = vsyncadd (%p1155_p5), %s209_s5, 4294965248  ;;  %p1156_p11 = scmp.eq.s32.totalorder %s928_s19, 0 }
  0x54   : > { %850 = dma.done.wait (%p1156_p11), [#allocation6], 2048   ;;  %p1157_p2 = pmov %p1156_p11 }
  0x55   : > { %p246_p4 = scmp.lt.s32.totalorder %s928_s19, 1  ;;  %v877_v0 = vmov 0   ;;  %v878_v1 = vmov 0.0|0.0   ;;  %v351_v3 = vld [vmem:[#allocation5] sm:$0xff]  ;;  %v352_v4 = vld [vmem:[#allocation5 + $0x8] sm:$0xff]  ;;  %v353_v6 = vld [vmem:[#allocation5 + $0x10] sm:$0xff] }
  0x56   : > { %852 = vsyncadd (%p1157_p2), [#allocation6], 4294965248  ;;  %740 = vset.pattern.permute.xlu0 %v877_v0  ;;  %653 = vmatprep.subr.bf16.mxu0 %v878_v1  ;;  %v654_v5 = vpack.c.bf16 %v352_v4, %v351_v3  ;;  %v354_v7 = vld [vmem:[#allocation5 + $0x18] sm:$0xff]  ;;  %v355_v9 = vld [vmem:[#allocation5 + $0x20] sm:$0xff]  ;;  %vm879_vm0 = vmmov 0   ;;  %v880_v21 = vmov 0.0  }
  0x57   : > { %s247_s23 = scalar_select %p246_p4, %s928_s19, 1  ;;  %v657_v8 = vpack.c.bf16 %v354_v7, %v353_v6  ;;  %v356_v10 = vld [vmem:[#allocation5 + $0x28] sm:$0xff]  ;;  %v357_v12 = vld [vmem:[#allocation5 + $0x30] sm:$0xff]  ;;  %v358_v13 = vld [vmem:[#allocation5 + $0x38] sm:$0xff]  ;;  %650 = vmatprep.mubr.msk.f32.mxu0 %vm879_vm0, %v880_v21  ;;  %vm383_vm1 = vcmask 1041409   ;;  %vm386_vm2 = vcmask 1042434  }
  0x58   : > { %655 = vmatpush3.bf16.msra.mxu0 %v654_v5  ;;  %v660_v11 = vpack.c.bf16 %v356_v10, %v355_v9  ;;  %v663_v15 = vpack.c.bf16 %v358_v13, %v357_v12  ;;  %v359_v16 = vld [vmem:[#allocation5 + $0x40] sm:$0xff]  ;;  %v360_v17 = vld [vmem:[#allocation5 + $0x48] sm:$0xff]  ;;  %v361_v19 = vld [vmem:[#allocation5 + $0x50] sm:$0xff]  ;;  %vm389_vm3 = vcmask 1043459   ;;  %vm392_vm4 = vcmask 1044484   ;;  %s592_s28 = sshll.u32 %s1052_s11, 3 }
  0x59   : > { %s593_s12 = sshll.u32 %s247_s23, 3  ;;  %656 = vmatprep.subr.bf16.mxu0 %v878_v1  ;;  %v666_v18 = vpack.c.bf16 %v360_v17, %v359_v16  ;;  %v362_v20 = vld [vmem:[#allocation5 + $0x58] sm:$0xff]  ;;  %v363_v23 = vld [vmem:[#allocation5 + $0x60] sm:$0xff]  ;;  %v364_v24 = vld [vmem:[#allocation5 + $0x68] sm:$0xff]  ;;  %vm395_vm5 = vcmask 1045509   ;;  %vm398_vm6 = vcmask 1046534  }
  0x5a   : > { %s249_s21 = scalar_lea.vmem %s1140_s1, %s593_s12  ;;  %v669_v22 = vpack.c.bf16 %v362_v20, %v361_v19  ;;  %v672_v25 = vpack.c.bf16 %v364_v24, %v363_v23  ;;  %v365_v26 = vld [vmem:[#allocation5 + $0x70] sm:$0xff]  ;;  %v366_v27 = vld [vmem:[#allocation5 + $0x78] sm:$0xff]  ;;  %v250_v30 = vld [vmem:[%s1056_s6] sm:$0xff]  ;;  %vm401_vm7 = vcmask 1047559   ;;  %s596_s7 = sshll.u32 %s928_s19, 7 }
  0x5b   : > { %v322_v2 = vld [vmem:[%s249_s21] sm:$0xff]  ;;  %v675_v28 = vpack.c.bf16 %v366_v27, %v365_v26  ;;  %v252_v29 = vld [vmem:[%s1056_s6 + $0x10] sm:$0xff]  ;;  %v251_v31 = vld [vmem:[%s1056_s6 + $0x8] sm:$0xff]  ;;  %s244_s26 = scalar_lea.vmem [#allocation7], %s592_s28  ;;  %s1095_s20 = scalar_lea.hbm %s1143_s4, %s596_s7 }
  0x5c   : > { %741 = vrcp.f32 %v322_v2  ;;  %658 = vmatpush3.bf16.msra.mxu0 %v657_v8  ;;  %v253_v32 = vld [vmem:[%s1056_s6 + $0x18] sm:$0xff]  ;;  %v254_v33 = vld [vmem:[%s1056_s6 + $0x20] sm:$0xff]  ;;  %v255_v34 = vld [vmem:[%s1056_s6 + $0x28] sm:$0xff]  ;;  %v266_v48 = vadd.f32 %v251_v31, %v250_v30  ;;  %s489_s8 = sshll.u32 %s244_s26, 4  ;;  %s476_s5 = scalar_lea.sflag [#allocation4], %s1052_s11  ;;  %s1097_s8 = int_to_ptr.vmem [resolvable:$true] %s489_s8 }
  0x5d   : > { %659 = vmatprep.subr.bf16.mxu0 %v878_v1  ;;  %v256_v35 = vld [vmem:[%s1056_s6 + $0x30] sm:$0xff]  ;;  %v257_v36 = vld [vmem:[%s1056_s6 + $0x38] sm:$0xff]  ;;  %v258_v37 = vld [vmem:[%s1056_s6 + $0x40] sm:$0xff]  ;;  %v273_v43 = vadd.f32 %v253_v32, %v252_v29  ;;  %v280_v44 = vadd.f32 %v255_v34, %v254_v33  ;;  %s881_s19 = smov [#allocation7]  }
  0x5e   : > { %v259_v38 = vld [vmem:[%s1056_s6 + $0x48] sm:$0xff]  ;;  %v260_v39 = vld [vmem:[%s1056_s6 + $0x50] sm:$0xff]  ;;  %v261_v40 = vld [vmem:[%s1056_s6 + $0x58] sm:$0xff]  ;;  %v287_v47 = vadd.f32 %v257_v36, %v256_v35  ;;  %v267_v56 = vrot.slane %v266_v48, 4  ;;  %s805_s23 = sshll.u32 %s881_s19, 4  ;;  %s806_s23 = int_to_ptr.vmem [resolvable:$false] %s805_s23 }
  0x5f   : > { %v262_v41 = vld [vmem:[%s1056_s6 + $0x60] sm:$0xff]  ;;  %v263_v42 = vld [vmem:[%s1056_s6 + $0x68] sm:$0xff]  ;;  %v264_v45 = vld [vmem:[%s1056_s6 + $0x70] sm:$0xff]  ;;  %v294_v49 = vadd.f32 %v259_v38, %v258_v37  ;;  %v301_v50 = vadd.f32 %v261_v40, %v260_v39  ;;  %v274_v53 = vrot.slane %v273_v43, 4  ;;  %v281_v54 = vrot.slane %v280_v44, 4  ;;  %s807_s12 = scalar_lea.vmem %s806_s23, 256  ;;  %p808_p13 = scmp.lt.s32.totalorder %s1097_s8, %s806_s23 }
  0x60   : > { %661 = vmatpush3.bf16.msra.mxu0 %v660_v11  ;;  %v265_v46 = vld [vmem:[%s1056_s6 + $0x78] sm:$0xff]  ;;  %v308_v51 = vadd.f32 %v263_v42, %v262_v41  ;;  %v288_v55 = vrot.slane %v287_v47, 4  ;;  %v268_v0 = vadd.f32 %v267_v56, %v266_v48  ;;  %s801_s6 = scalar_lea.vmem %s1097_s8, 128 }
  0x61   : > { %662 = vmatprep.subr.bf16.mxu0 %v878_v1  ;;  %v315_v52 = vadd.f32 %v265_v46, %v264_v45  ;;  %v295_v57 = vrot.slane %v294_v49, 4  ;;  %v302_v58 = vrot.slane %v301_v50, 4  ;;  %v275_v61 = vadd.f32 %v274_v53, %v273_v43  ;;  %p802_p6 = scmp.ne.s32.totalorder %s1097_s8, %s801_s6  ;;  %p809_p3 = scmp.lt.s32.totalorder %s807_s12, %s801_s6 }
  0x62   : > { %v309_v59 = vrot.slane %v308_v51, 4  ;;  %v282_v62 = vadd.f32 %v281_v54, %v280_v44  ;;  %v289_v63 = vadd.f32 %v288_v55, %v287_v47  ;;  %v269_v8 = vrot.slane %v268_v0, 2 }
  0x63   : > { %v316_v60 = vrot.slane %v315_v52, 4  ;;  %v303_v2 = vadd.f32 %v302_v58, %v301_v50  ;;  %v276_v5 = vrot.slane %v275_v61, 2  ;;  %p803_p8 = pnand %p802_p6, %p1001_p12  ;;  %p810_p7 = por %p809_p3, %p808_p13 }
  0x64   : > { %664 = vmatpush3.bf16.msra.mxu0 %v663_v15  ;;  %v310_v3 = vadd.f32 %v309_v59, %v308_v51  ;;  %v283_v6 = vrot.slane %v282_v62, 2  ;;  %v290_v7 = vrot.slane %v289_v63, 2  ;;  %v270_v16 = vadd.f32 %v269_v8, %v268_v0 }
  0x65   : > { %665 = vmatprep.subr.bf16.mxu0 %v878_v1  ;;  %v317_v4 = vadd.f32 %v316_v60, %v315_v52  ;;  %v304_v10 = vrot.slane %v303_v2, 2  ;;  %v277_v13 = vadd.f32 %v276_v5, %v275_v61  ;;  %p804_p10 = pneg %p803_p8 }
  0x66   : > { %v742_v14 = vpop.eup %741  ;;  %v311_v11 = vrot.slane %v310_v3, 2  ;;  %v291_v15 = vadd.f32 %v290_v7, %v289_v63  ;;  %v271_v24 = vrot.slane %v270_v16, 1 }
  0x67   : > { %326 = vperm.xlu0 %740, %v742_v14   ;;  %v318_v12 = vrot.slane %v317_v4, 2  ;;  %v284_v14 = vadd.f32 %v283_v6, %v282_v62  ;;  %v278_v21 = vrot.slane %v277_v13, 1  ;;  %p811_p9 = pnand %p810_p7, %p804_p10 }
  0x68   : > { %667 = vmatpush3.bf16.msra.mxu0 %v666_v18  ;;  %v305_v18 = vadd.f32 %v304_v10, %v303_v2  ;;  %v312_v19 = vadd.f32 %v311_v11, %v310_v3  ;;  %v292_v23 = vrot.slane %v291_v15, 1  ;;  %v272_v33 = vadd.f32 %v271_v24, %v270_v16  ;;  %v594_v3 = vld [vmem:[%s1142_s3] ss:$0 sm:$0xff] }
  0x69   : > { %668 = vmatprep.subr.bf16.mxu0 %v878_v1  ;;  %v319_v20 = vadd.f32 %v318_v12, %v317_v4  ;;  %v279_v29 = vadd.f32 %v278_v21, %v277_v13 }
  0x6a   : > { %v306_v26 = vrot.slane %v305_v18, 1  ;;  %v313_v27 = vrot.slane %v312_v19, 1  ;;  %v293_v31 = vadd.f32 %v292_v23, %v291_v15 }
  0x6c   : > { %670 = vmatpush3.bf16.msra.mxu0 %v669_v22  ;;  %v285_v22 = vrot.slane %v284_v14, 1  ;;  %v307_v35 = vadd.f32 %v306_v26, %v305_v18  ;;  %v314_v39 = vadd.f32 %v313_v27, %v312_v19 }
  0x6d   : > { %671 = vmatprep.subr.bf16.mxu0 %v878_v1 }
  0x6e   : > { %v286_v30 = vadd.f32 %v285_v22, %v284_v14 }
  0x70   : > { %673 = vmatpush3.bf16.msra.mxu0 %v672_v25 }
  0x71   : > { %674 = vmatprep.subr.bf16.mxu0 %v878_v1  ;;  %v296_v1 = vadd.f32 %v295_v57, %v294_v49 }
  0x73   : > { %v297_v9 = vrot.slane %v296_v1, 2 }
  0x74   : > { %676 = vmatpush3.bf16.msra.mxu0 %v675_v28  ;;  %v320_v28 = vrot.slane %v319_v20, 1 }
  0x75   : > { %v298_v17 = vadd.f32 %v297_v9, %v296_v1 }
  0x76   : > { %v321_v40 = vadd.f32 %v320_v28, %v319_v20 }
  0x77   : > { %v299_v25 = vrot.slane %v298_v17, 1 }
  0x79   : > { %v300_v34 = vadd.f32 %v299_v25, %v298_v17 }
  0xe6   : > { %v327_v32 = vpop.permute.xlu0 %326 }
  0xe7   : > { %v328_v36 = vrot.slane %v327_v32, 1  ;;  %v329_v37 = vrot.slane %v327_v32, 2  ;;  %v330_v38 = vrot.slane %v327_v32, 3  ;;  %v331_v41 = vrot.slane %v327_v32, 4 }
  0xe8   : > { %v332_v42 = vrot.slane %v327_v32, 5  ;;  %v333_v43 = vrot.slane %v327_v32, 6  ;;  %v334_v46 = vrot.slane %v327_v32, 7  ;;  %v343_v49 = vmul.f32 %v327_v32, %v272_v33 }
  0xe9   : > { %v344_v44 = vmul.f32 %v328_v36, %v279_v29  ;;  %v345_v45 = vmul.f32 %v329_v37, %v286_v30  ;;  %v346_v47 = vmul.f32 %v330_v38, %v293_v31  ;;  %v347_v48 = vmul.f32 %v331_v41, %v300_v34 }
  0xea   : > { %v348_v51 = vmul.f32 %v332_v42, %v307_v35  ;;  %v349_v53 = vmul.f32 %v333_v43, %v314_v39  ;;  %v350_v54 = vmul.f32 %v334_v46, %v321_v40 }
  0xeb   : > { %v382_v50 = vrot.slane %v344_v44, 7  ;;  %v385_v52 = vrot.slane %v345_v45, 6  ;;  %v388_v56 = vrot.slane %v346_v47, 5  ;;  %v391_v58 = vrot.slane %v347_v48, 4 }
  0xec   : > { %v394_v60 = vrot.slane %v348_v51, 3  ;;  %v397_v62 = vrot.slane %v349_v53, 2  ;;  %v400_v0 = vrot.slane %v350_v54, 1 }
  0xed   : > { %v384_v55 = vsel %vm383_vm1, %v382_v50, %v343_v49 }
  0xee   : > { %v387_v57 = vsel %vm386_vm2, %v385_v52, %v384_v55 }
  0xef   : > { %v390_v59 = vsel %vm389_vm3, %v388_v56, %v387_v57 }
  0xf0   : > { %v393_v61 = vsel %vm392_vm4, %v391_v58, %v390_v59 }
  0xf1   : > { %v396_v63 = vsel %vm395_vm5, %v394_v60, %v393_v61 }
  0xf2   : > { %v399_v1 = vsel %vm398_vm6, %v397_v62, %v396_v63 }
  0xf3   : > { %v402_v2 = vsel %vm401_vm7, %v400_v0, %v399_v1 }
  0xf4   : > { %651 = vmatmul.mubr.f32.vlgmr.msra.gmra.mrb[0].mxu0 %v402_v2 }
 0x1c7   : > { %v470_v4 = vpop.f32.mrb[0].mxu0 }
 0x1c8   : > { %v471_v5 = vadd.f32 %v594_v3, %v470_v4  ;;  %v652_v6 = vpop.f32.mrb[1].mxu0 }
 0x1ca   : > { %474 = vst [vmem:[%s244_s26] sm:$0xff] %v471_v5 }
 0x1cb   : > { %814 = shalt.err (!%p811_p9)
}
 0x1cc   : > { %s815_s11 = scalar_lea.hbm %s1095_s20, 128  ;;  %s819_s21 = scalar_lea.hbm %s1143_s4, 256 }
 0x1cd   : > { %p816_p1 = scmp.ne.s32.totalorder %s1095_s20, %s815_s11  ;;  %p820_p11 = scmp.lt.u32.totalorder %s1095_s20, %s1143_s4 }
 0x1ce   : > { %p821_p2 = scmp.lt.u32.totalorder %s819_s21, %s815_s11  ;;  %p823_p6 = scmp.lt.u32.totalorder %s815_s11, %s1095_s20 }
 0x1cf   : > { %p817_p0 = pnand %p816_p1, %p1001_p12 }
 0x1d0   : > { %p822_p4 = por %p821_p2, %p820_p11 }
 0x1d1   : > { %p818_p5 = pneg %p817_p0 }
 0x1d2   : > { %p824_p8 = por %p823_p6, %p822_p4 }
 0x1d4   : > { %p825_p10 = pnand %p824_p8, %p818_p5 }
 0x1d6   : > { %828 = shalt.err (!%p825_p10)
}
 0x1d7   : > { %683 = dma.vmem_to_hbm [thread:$0]  (%p1001_p12), %s1097_s8, 128, %s1095_s20, %s476_s5  }
 0x1d8 PF: > { %s501_s10 = sand.u32 1, %s859_s15   ;;  %p1158_p13 = scmp.ne.s32.totalorder %s1148_s22, 0 }
 0x1d9   : > { %p1159_p3 = scmp.ge.s32.totalorder %s871_s18, 2  ;;  %s502_s7 = scalar_lea.sflag [#allocation4], %s501_s10 }
 0x1db   : > { %p694_p7 = pnand %p1159_p3, %p1158_p13 }
 0x1dd   : > { %854 = dma.done.wait (!%p694_p7), %s502_s7, 128  }
 0x1de   : > { %856 = vsyncadd (!%p694_p7), %s502_s7, 4294967168  ;;  %p18_p9 = scmp.ge.s32.totalorder %s963_s27, 4   ;;  %s1160_s15 = smov %s863_s16 }
 0x1df   : > { %s1161_s16 = smov %s867_s17  ;;  %s1162_s17 = smov %s997_s24 }
 0x1e0   : > { %s1163_s18 = smov %s963_s27  ;;  %20 = sbr.rel (!%p18_p9) target bundleno = 6 (0x6), region = 88 }
 0x1e7   :  { %507 = vsyncpa [#allocation3], 1 }
 0x1e8   :  { %509 = vsyncpa [#allocation3 + $0x1], 1 }
 0x1e9   :  { %510 = vsyncpa [#allocation6], 1 }
 0x1ea   :  { %511 = vsyncpa [#allocation4], 1 }
 0x1eb   :  { %513 = vsyncpa [#allocation4 + $0x1], 1 }

</bundles_post_ra>
